<compile_context>
chip_gen: v5e
topology: v5e:2x2
jax: 0.10.0
libtpu: 0.0.40
codegen_flags: <defaults>
</compile_context>

<pallas_src>
import jax
import jax.numpy as jnp
from jax.experimental import pallas as pl
from jax.experimental.pallas import tpu as pltpu


def _round_up(x, m):
    return (x + m - 1) // m * m


def _plan_kn_tiles(K, N, tk=512, tn=512):
    """Clamp K/N tile sizes to the (aligned) problem and return padded dims."""
    tk = min(tk, _round_up(K, 128))
    tn = min(tn, _round_up(N, 128))
    return tk, tn, _round_up(K, tk), _round_up(N, tn)


# ----------------------------------------------------------------------------
# Pallas kernels: tiled matmul + bias (the inner module's hot path)
# ----------------------------------------------------------------------------
def _linear_kernel_f32(x_ref, w_ref, b_ref, o_ref):
    # f32 output: accumulate directly into the K-resident output block.
    # x_ref: (tm, tk) bf16, w_ref: (tk, tn) bf16, b_ref: (1, tn) f32,
    # o_ref: (tm, tn) f32 (index_map ignores k -> stays in VMEM across K).
    k = pl.program_id(2)

    @pl.when(k == 0)
    def _():
        # Fold the bias into the init so there is no separate epilogue pass.
        o_ref[...] = jnp.broadcast_to(b_ref[...], o_ref.shape)

    o_ref[...] += jnp.dot(
        x_ref[...], w_ref[...], preferred_element_type=jnp.float32
    )


def _linear_kernel_lowp(x_ref, w_ref, b_ref, o_ref, acc_ref):
    # Narrow (e.g. bf16) output: keep f32 accumulation in VMEM scratch and
    # cast only once at the last K step (halves output HBM writeback).
    k = pl.program_id(2)

    @pl.when(k == 0)
    def _():
        acc_ref[...] = jnp.broadcast_to(b_ref[...], acc_ref.shape)

    acc_ref[...] += jnp.dot(
        x_ref[...], w_ref[...], preferred_element_type=jnp.float32
    )

    @pl.when(k == pl.num_programs(2) - 1)
    def _():
        o_ref[...] = acc_ref[...].astype(o_ref.dtype)


def pallas_linear(x2d, w, b2d, *, n_out=None, tm=512, tn=512, tk=512,
                  out_dtype=jnp.float32):
    """y = x2d @ w + b2d on the MXU: bf16 inputs, f32 accumulation.

    `w` / `b2d` may already be padded to tile multiples (done once in
    LinearModule.__init__); `n_out` is the logical output width.
    """
    M, K = x2d.shape
    Kw, Nw = w.shape                      # possibly pre-padded K/N
    assert Kw >= K and b2d.shape == (1, Nw)
    if n_out is None:
        n_out = Nw

    # bf16 is the MXU's native input precision on v5e/v6e/v7x; these casts are
    # no-ops when the caller (LinearModule) already stores bf16 params.
    x2d = x2d.astype(jnp.bfloat16)
    w = w.astype(jnp.bfloat16)
    b2d = b2d.astype(jnp.float32)

    # Tile clamps: tm to a multiple of 16 (bf16 sublane packing), tk/tn to 128.
    tm = min(tm, _round_up(M, 16))
    tk = min(tk, _round_up(Kw, 128))
    tn = min(tn, _round_up(Nw, 128))

    Mp = _round_up(M, tm)
    Kp = _round_up(Kw, tk)
    Np = _round_up(Nw, tn)

    # Megacore (v7x): if the whole problem is a single (M, N) block, split one
    # parallel axis (when legal) so both TensorCores get work.  No-op on the
    # single-TC v5e/v6e.
    if (Mp // tm) * (Np // tn) < 2:
        if tn >= 256 and tn % 256 == 0:
            tn //= 2
        elif tm >= 32 and tm % 32 == 0:
            tm //= 2

    # Pad to whole tiles so every block is dense: unmasked vst, full MXU
    # columns.  Zero padding is mathematically inert (zero K rows / N cols).
    if (Mp, Kp) != (M, K):
        x2d = jnp.pad(x2d, ((0, Mp - M), (0, Kp - K)))
    if (Kp, Np) != (Kw, Nw):
        w = jnp.pad(w, ((0, Kp - Kw), (0, Np - Nw)))
    if Np != Nw:
        b2d = jnp.pad(b2d, ((0, 0), (0, Np - Nw)))

    grid = (Mp // tm, Np // tn, Kp // tk)
    gm, gn = grid[0], grid[1]
    out_bytes = jnp.dtype(out_dtype).itemsize

    # Honest byte count: x is re-streamed once per N block, W once per M block.
    cost = pl.CostEstimate(
        flops=2 * Mp * Kp * Np,
        transcendentals=0,
        bytes_accessed=(gn * Mp * Kp * 2 + gm * Kp * Np * 2
                        + Mp * Np * out_bytes + Np * 4),
    )

    if jnp.dtype(out_dtype) == jnp.dtype(jnp.float32):
        kernel = _linear_kernel_f32
        scratch_shapes = []
    else:
        kernel = _linear_kernel_lowp
        scratch_shapes = [pltpu.VMEM((tm, tn), jnp.float32)]

    out = pl.pallas_call(
        kernel,
        out_shape=jax.ShapeDtypeStruct((Mp, Np), out_dtype),
        grid=grid,
        in_specs=[
            pl.BlockSpec((tm, tk), lambda i, j, k: (i, k)),
            pl.BlockSpec((tk, tn), lambda i, j, k: (k, j)),
            pl.BlockSpec((1, tn), lambda i, j, k: (0, j)),
        ],
        out_specs=pl.BlockSpec((tm, tn), lambda i, j, k: (i, j)),
        scratch_shapes=scratch_shapes,
        compiler_params=pltpu.CompilerParams(
            # M/N parallel -> megacore sharding on v7x; K is the reduction.
            dimension_semantics=("parallel", "parallel", "arbitrary"),
            # ~5 MiB footprint at 512 tiles (bf16 inputs double-buffered +
            # f32 output block); 32 MiB is safe on v5e (16 MiB scoped
            # default), v6e (32 MiB) and v7x (64 MiB physical per TC).
            vmem_limit_bytes=32 * 1024 * 1024,
        ),
        cost_estimate=cost,
    )(x2d, w, b2d)

    if (Mp, Np) != (M, n_out):
        out = out[:M, :n_out]
    return out


# ----------------------------------------------------------------------------
# Inner module (what NoDataParallel wraps) — deterministic params
# ----------------------------------------------------------------------------
class LinearModule:
    """Linear(H_in -> H_out) whose forward is the Pallas kernel above."""

    def __init__(self, h_in, h_out, key, *, tk=512, tn=512,
                 out_dtype=jnp.float32):
        kw, kb = jax.random.split(key)
        bound = 1.0 / (h_in ** 0.5)
        w = jax.random.uniform(kw, (h_in, h_out), jnp.float32, -bound, bound)
        b = jax.random.uniform(kb, (1, h_out), jnp.float32, -bound, bound)

        # Hoisted per-call work: cast W to bf16 and pad W / bias to K/N tile
        # multiples ONCE here, so the forward path only (maybe) pads x.
        self.tk, self.tn, Kp, Np = _plan_kn_tiles(h_in, h_out, tk, tn)
        self.weight = jnp.pad(
            w, ((0, Kp - h_in), (0, Np - h_out))).astype(jnp.bfloat16)
        self.bias = jnp.pad(b, ((0, 0), (0, Np - h_out)))
        self.h_in = h_in
        self.h_out = h_out
        self.out_dtype = out_dtype
        # TODO(synk): keep activations bf16 upstream (or allow_input_fusion)
        # so the x cast never materializes an extra HBM copy per forward.

    def __call__(self, x):
        # x: (B, S, H_in) -> (B, S, H_out); flatten rows into one lane-dense
        # matmul so a single pallas_call amortizes launch/DMA overhead.
        B, S, H = x.shape
        assert H == self.h_in
        y2d = pallas_linear(
            x.reshape(B * S, H), self.weight, self.bias,
            n_out=self.h_out, tk=self.tk, tn=self.tn,
            out_dtype=self.out_dtype)
        return y2d.reshape(B, S, self.h_out)


# ----------------------------------------------------------------------------
# NoDataParallel: exact semantic port of the PyTorch wrapper (pure delegation)
# ----------------------------------------------------------------------------
class NoDataParallel:
    def __init__(self, module):
        object.__setattr__(self, "module", module)

    def __getattr__(self, name):
        # Delegate unknown attribute lookups to the wrapped module
        # (mirrors the PyTorch __getattr__ fallthrough).
        return getattr(object.__getattribute__(self, "module"), name)

    def forward(self, *inputs, **kwargs):
        return self.module(*inputs, **kwargs)

    def __call__(self, *inputs, **kwargs):
        return self.forward(*inputs, **kwargs)


# ----------------------------------------------------------------------------
if __name__ == "__main__":
    key = jax.random.PRNGKey(0)
    k_x, k_mod = jax.random.split(key)

    # Small but lane-dense shapes: batch=2, seq=8, hidden=128 (multiple of 128
    # so the output tile is lane-dense and MXU columns are fully used).
    B, S, H = 2, 8, 128
    x = jax.random.normal(k_x, (B, S, H), jnp.float32)

    inner = LinearModule(H, H, k_mod)
    wrapped = NoDataParallel(inner)

    # Forward through the wrapper (delegates to inner module's Pallas kernel).
    y = wrapped(x)
    y = jax.block_until_ready(y)

    # Wrapper output must equal the inner module output exactly.
    y_inner = jax.block_until_ready(inner(x))

    # Plain-JAX reference with the same bf16-input / f32-accumulate recipe.
    x2d_bf16 = x.reshape(B * S, H).astype(jnp.bfloat16)
    y_ref = jnp.dot(
        x2d_bf16, inner.weight, preferred_element_type=jnp.float32
    ) + inner.bias
    y_ref = y_ref.reshape(B, S, H)

    assert y.shape == (B, S, H)
    assert y.dtype == jnp.float32
    assert jnp.array_equal(y, y_inner)
    assert jnp.allclose(y, y_ref, atol=1e-2, rtol=1e-2)

    # Exercise the bf16-output path (f32 scratch accumulation, cast epilogue).
    y_bf16 = pallas_linear(x.reshape(B * S, H), inner.weight, inner.bias,
                           n_out=H, out_dtype=jnp.bfloat16)
    y_bf16 = jax.block_until_ready(y_bf16)
    assert y_bf16.dtype == jnp.bfloat16
    assert jnp.allclose(y_bf16.astype(jnp.float32).reshape(B, S, H), y_ref,
                        atol=5e-2, rtol=5e-2)

    # Attribute delegation check (mirrors __getattr__ fallthrough semantics).
    assert wrapped.weight is inner.weight

    print("KERNEL_OK")
</pallas_src>

<mosaic_0001>
module attributes {stable_mosaic.version = 11 : i64} {
  func.func @_linear_kernel_f32(%arg0: i32, %arg1: i32, %arg2: i32, %arg3: memref<16x128xbf16, #tpu.memory_space<vmem>>, %arg4: memref<128x128xbf16, #tpu.memory_space<vmem>>, %arg5: memref<1x128xf32, #tpu.memory_space<vmem>>, %arg6: memref<16x128xf32, #tpu.memory_space<vmem>>) attributes {dimension_semantics = [#tpu.dimension_semantics<parallel>, #tpu.dimension_semantics<parallel>, #tpu.dimension_semantics<arbitrary>], iteration_bounds = array<i64: 1, 1, 1>, scalar_prefetch = 0 : i64, scratch_operands = 0 : i64, tpu.core_type = #tpu.core_type<tc>, window_params = [{transform_indices = @transform_0, window_bounds = array<i64: 16, 128>}, {transform_indices = @transform_1, window_bounds = array<i64: 128, 128>}, {transform_indices = @transform_2, window_bounds = array<i64: 1, 128>}, {transform_indices = @transform_3, window_bounds = array<i64: 16, 128>}]} {
    %c0_i32 = arith.constant 0 : i32
    %0 = arith.cmpi eq, %arg2, %c0_i32 : i32
    %1 = arith.extui %0 : i1 to i32
    %c0_i32_0 = arith.constant 0 : i32
    %2 = arith.cmpi ne, %1, %c0_i32_0 : i32
    scf.if %2 {
      %c0_8 = arith.constant 0 : index
      %c0_9 = arith.constant 0 : index
      %9 = vector.load %arg5[%c0_8, %c0_9] : memref<1x128xf32, #tpu.memory_space<vmem>>, vector<1x128xf32>
      %10 = vector.shape_cast %9 : vector<1x128xf32> to vector<1x128xf32>
      %11 = vector.broadcast %10 : vector<1x128xf32> to vector<16x128xf32>
      %c0_10 = arith.constant 0 : index
      %c0_11 = arith.constant 0 : index
      %12 = vector.load %arg6[%c0_10, %c0_11] : memref<16x128xf32, #tpu.memory_space<vmem>>, vector<16x128xf32>
      tpu.vector_store %arg6[%c0_10, %c0_11], %11 {strides = array<i32>} : memref<16x128xf32, #tpu.memory_space<vmem>>, vector<16x128xf32>,
    } else {
    }
    %c0 = arith.constant 0 : index
    %c0_1 = arith.constant 0 : index
    %3 = vector.load %arg6[%c0, %c0_1] : memref<16x128xf32, #tpu.memory_space<vmem>>, vector<16x128xf32>
    %c0_2 = arith.constant 0 : index
    %c0_3 = arith.constant 0 : index
    %4 = vector.load %arg3[%c0_2, %c0_3] : memref<16x128xbf16, #tpu.memory_space<vmem>>, vector<16x128xbf16>
    %c0_4 = arith.constant 0 : index
    %c0_5 = arith.constant 0 : index
    %5 = vector.load %arg4[%c0_4, %c0_5] : memref<128x128xbf16, #tpu.memory_space<vmem>>, vector<128x128xbf16>
    %cst = arith.constant dense<0.000000e+00> : vector<16x128xf32>
    %6 = tpu.matmul %4, %5, %cst {dimension_numbers = #tpu.dot_dimension_numbers<[1], [0], [0], [1], [0, 0, 1, 1], [], []>} : vector<16x128xbf16>, vector<128x128xbf16>, vector<16x128xf32> -> vector<16x128xf32>
    %7 = arith.addf %3, %6 : vector<16x128xf32>
    %c0_6 = arith.constant 0 : index
    %c0_7 = arith.constant 0 : index
    %8 = vector.load %arg6[%c0_6, %c0_7] : memref<16x128xf32, #tpu.memory_space<vmem>>, vector<16x128xf32>
    tpu.vector_store %arg6[%c0_6, %c0_7], %7 {strides = array<i32>} : memref<16x128xf32, #tpu.memory_space<vmem>>, vector<16x128xf32>,
    return
  }
  func.func @transform_0(%arg0: i32, %arg1: i32, %arg2: i32) -> (i32, i32) {
    %c0_i32 = arith.constant 0 : i32
    return %arg0, %arg2 : i32, i32
  }
  func.func @transform_1(%arg0: i32, %arg1: i32, %arg2: i32) -> (i32, i32) {
    %c0_i32 = arith.constant 0 : i32
    return %arg2, %arg1 : i32, i32
  }
  func.func @transform_2(%arg0: i32, %arg1: i32, %arg2: i32) -> (i32, i32) {
    %c0_i32 = arith.constant 0 : i32
    %c0_i32_0 = arith.constant 0 : i32
    return %c0_i32, %arg1 : i32, i32
  }
  func.func @transform_3(%arg0: i32, %arg1: i32, %arg2: i32) -> (i32, i32) {
    %c0_i32 = arith.constant 0 : i32
    return %arg0, %arg1 : i32, i32
  }
}

</mosaic_0001>

<bundles_post_ra>
// kernel: tpu_custom_call.1
= control target key start
LH: loop header
LB: loop body
LE: loop exit
PB: predicated region body
PF: predicated region fallthrough
CT: control target
= control target key end

     0   :  { %8 = vsyncpa [#allocation3], 0  ;;  %s339_s0 = inlined_call_operand.hbm [shape: bf16[16,128], index: 0, kind: input, shape index: {}]   ;;  %s340_s1 = inlined_call_operand.hbm [shape: bf16[128,128], index: 1, kind: input, shape index: {}]   ;;  %s341_s2 = inlined_call_operand.vmem [shape: f32[1,128], index: 2, kind: input, shape index: {}]   ;;  %s342_s3 = inlined_call_operand.hbm [shape: f32[16,128], index: 3, kind: output, shape index: {}]  }
   0x1   :  { %9 = vsyncpa [#allocation6], 0 }
   0x2   :  { %10 = vsyncpa [#allocation4], 0  ;;  %s15_s14 = sshll.u32 %s339_s0, 4  ;;  %s300_s15 = smov [#allocation2]   ;;  %s16_s14 = int_to_ptr.hbm [resolvable:$true] %s15_s14 }
   0x3   :  { %s17_s16 = sshll.u32 %s300_s15, 4  ;;  %s28_s19 = sshll.u32 %s340_s1, 4  ;;  %s18_s16 = int_to_ptr.vmem [resolvable:$true] %s17_s16  ;;  %s29_s19 = int_to_ptr.hbm [resolvable:$true] %s28_s19 }
   0x4   :  { %s301_s20 = smov 64   ;;  %s302_s21 = smov 4  }
   0x5   :  { %23 = dma.hbm_to_vmem [thread:$0]  %s16_s14, 128, %s18_s16, [#allocation3], %s301_s20, %s301_s20, %s302_s21  }
   0x6   :  { %s303_s22 = smov [#allocation5]  }
   0x7   :  { %s30_s23 = sshll.u32 %s303_s22, 4  ;;  %s31_s23 = int_to_ptr.vmem [resolvable:$true] %s30_s23 }
   0x8   :  { %36 = dma.hbm_to_vmem [thread:$0]  %s29_s19, 1024, %s31_s23, [#allocation6], %s301_s20, %s301_s20, %s302_s21  }
   0x9   :  { %294 = dma.done.wait [#allocation3], 128  }
   0xa   :  { %295 = vsyncadd [#allocation3], 4294967168 }
   0xb   :  { %296 = dma.done.wait [#allocation6], 1024  }
   0xc   :  { %297 = vsyncadd [#allocation6], 4294966272  ;;  %v213_v0 = vld [vmem:[#allocation5 + $0x38] sm:$0xff]  ;;  %v212_v1 = vld [vmem:[#allocation5 + $0x30] sm:$0xff]  ;;  %s304_s24 = smov [#allocation7]   ;;  %s155_s28 = sshll.u32 %s342_s3, 4  ;;  %s156_s28 = int_to_ptr.hbm [resolvable:$true] %s155_s28 }
   0xd   :  { %131 = vmatpush.bf16.msra.mxu0 %v213_v0  ;;  %v211_v2 = vld [vmem:[#allocation5 + $0x28] sm:$0xff]  ;;  %v210_v3 = vld [vmem:[#allocation5 + $0x20] sm:$0xff]  ;;  %v209_v4 = vld [vmem:[#allocation5 + $0x18] sm:$0xff]  ;;  %s153_s25 = sshll.u32 %s304_s24, 4  ;;  %s305_s29 = smov 128   ;;  %s154_s25 = int_to_ptr.vmem [resolvable:$true] %s153_s25 }
   0xe   :  { %v208_v5 = vld [vmem:[#allocation5 + $0x10] sm:$0xff]  ;;  %v207_v6 = vld [vmem:[#allocation5 + $0x8] sm:$0xff]  ;;  %v206_v7 = vld [vmem:[#allocation5] sm:$0xff]  ;;  %s306_s30 = smov 8  }
   0xf   :  { %v205_v8 = vld [vmem:[#allocation2] sm:$0xff] }
  0x10   :  { %v221_v9 = vld [vmem:[%s341_s2] ss:$0 sm:$0xff] }
  0x11   :  { %132 = vmatpush.bf16.msra.mxu0 %v212_v1 }
  0x15   :  { %133 = vmatpush.bf16.msra.mxu0 %v211_v2 }
  0x19   :  { %134 = vmatpush.bf16.msra.mxu0 %v210_v3 }
  0x1d   :  { %135 = vmatpush.bf16.msra.mxu0 %v209_v4 }
  0x21   :  { %136 = vmatpush.bf16.msra.mxu0 %v208_v5 }
  0x25   :  { %137 = vmatpush.bf16.msra.mxu0 %v207_v6 }
  0x29   :  { %138 = vmatpush.bf16.msra.mxu0 %v206_v7 }
  0x2c   :  { %139 = vmatmul.bf16.vlgmr.msra.gmra.mxu0 %v205_v8 }
  0xa9   :  { %v140_v10 = vpop.f32.mrf.mxu0 }
  0xaa   :  { %v145_v11 = vadd.f32 %v221_v9, %v140_v10 }
  0xac   :  { %147 = vst [vmem:[#allocation7] sm:$0xff] %v145_v11 }
  0xb1   :  { %v142_v12 = vpop.f32.mrf.mxu0 }
  0xb2   :  { %v146_v13 = vadd.f32 %v221_v9, %v142_v12 }
  0xb4   :  { %148 = vst [vmem:[#allocation7 + $0x8] sm:$0xff] %v146_v13 }
  0xb5   :  { %161 = dma.vmem_to_hbm [thread:$0]  %s154_s25, 256, %s156_s28, [#allocation4], %s305_s29, %s305_s29, %s306_s30  }
  0xb6   :  { %298 = dma.done.wait [#allocation4], 256  }
  0xb7   :  { %299 = vsyncadd [#allocation4], 4294967040 }
  0xb8   :  { %166 = vsyncpa [#allocation3], 1 }
  0xb9   :  { %167 = vsyncpa [#allocation6], 1 }
  0xba   :  { %168 = vsyncpa [#allocation4], 1 }

</bundles_post_ra>
